<compile_context>
chip_gen: v6e
topology: v6e:2x2x1
jax: 0.10.0
libtpu: 0.0.40
codegen_flags: <defaults>
</compile_context>

<pallas_src>
import numpy as np
import jax
import jax.numpy as jnp
from jax.experimental import pallas as pl
from jax.experimental.pallas import tpu as pltpu


# -----------------------------------------------------------------------------
# Sinusoidal PE table, mirroring PositionalEncoding.__init__:
#   pe[:, 0::2] = sin(pos / div), pe[:, 1::2] = cos(pos / div),
#   div = 10000 ** (arange(0, e_dim, 2) / e_dim)
# -----------------------------------------------------------------------------
def build_pe(e_dim: int, max_len: int = 512, dtype=jnp.float32) -> jnp.ndarray:
    position = np.arange(0, max_len, dtype=np.float32)[:, None]          # (max_len, 1)
    div_term = (10000.0 ** (np.arange(0.0, e_dim, 2.0, dtype=np.float32)
                            / np.float32(e_dim)))                        # (e_dim/2,)
    pe = np.zeros((max_len, e_dim), dtype=np.float32)
    pe[:, 0::2] = np.sin(position / div_term)
    pe[:, 1::2] = np.cos(position / div_term)
    return jnp.asarray(pe, dtype=dtype)                                  # (max_len, e_dim)


# -----------------------------------------------------------------------------
# Generation-aware tiling helpers
# -----------------------------------------------------------------------------
def _device_kind() -> str:
    try:
        return jax.devices()[0].device_kind.lower()
    except Exception:
        return ""


def _tpu_generation_params():
    """Returns (block_cap_bytes, dual_tensorcore)."""
    kind = _device_kind()
    if ("v5e" in kind) or ("v5 lite" in kind) or ("v5lite" in kind):
        return (3 << 19), False        # 1.5 MiB cap: 4x blocks stay < 16 MiB scoped VMEM
    if "v6" in kind:
        return (4 << 20), False        # v6e: single TC, plenty of VMEM headroom
    if ("7x" in kind) or ("v7" in kind):
        return (4 << 20), True         # v7x: 2 TCs, 3.2 TB/s -> big blocks + even split
    if ("v4" in kind) or ("v5p" in kind):
        return (4 << 20), True         # megacore chips
    return (2 << 20), False            # unknown: conservative


def _sublane_granule(dtype) -> int:
    """Row-tile rounding granule: 8 (f32), 16 (bf16), 32 (int8/fp8) — keeps packed
    sublanes fully dense."""
    itemsize = np.dtype(dtype).itemsize
    return max(8, 32 // max(itemsize, 1))


def _round_up(x: int, m: int) -> int:
    return ((x + m - 1) // m) * m


def _choose_row_tile(rows: int, row_bytes: int, granule: int,
                     cap_bytes: int, dual_tc: bool) -> int:
    """Pick TM: multiple of `granule` (or == rows), ~cap_bytes per block, and an
    even grid-step count on dual-TensorCore chips so both TCs stream evenly."""
    if rows <= granule:
        return rows                                   # block dim == full array dim
    tm = min(rows, max(granule, cap_bytes // max(row_bytes, 1)))
    tm = max(granule, (tm // granule) * granule)
    if dual_tc:
        steps = pl.cdiv(rows, tm)
        if steps % 2:
            cand = max(granule, _round_up(pl.cdiv(rows, steps + 1), granule))
            if pl.cdiv(rows, cand) % 2:               # rounding flipped it back to odd
                cand = max(granule, _round_up(pl.cdiv(rows, 2), granule))
            tm = cand
    return min(tm, rows)


# -----------------------------------------------------------------------------
# Kernel 1: standalone PositionalEncoding forward (x + pe)
# -----------------------------------------------------------------------------
def pe_add_kernel(x_ref, pe_ref, o_ref):
    # x_ref: (TM, S*E); pe_ref: (1, S*E) broadcast over rows. Pure VPU add.
    o_ref[...] = (x_ref[...] + pe_ref[...]).astype(o_ref.dtype)


def prepare_pe_flat(pe: jnp.ndarray, seq_len: int, dtype) -> jnp.ndarray:
    """Hoisted once per (seq_len, dtype): lane-dense (1, S*E) PE operand."""
    return pe[:seq_len, :].astype(dtype).reshape(1, -1)


def positional_encoding_forward(x: jnp.ndarray, pe: jnp.ndarray,
                                dropout_p: float = 0.1, training: bool = False,
                                pe_flat: jnp.ndarray | None = None) -> jnp.ndarray:
    """x: (B, N, S, E); pe: (max_len, E). Returns x + pe[None, None, :S, :]."""
    if training:
        # TODO(synk): in-kernel dropout via pltpu.prng_seed/prng_random_bits (hidden
        # under the DMA stream) — not implemented; eval semantics only.
        raise NotImplementedError("training-mode dropout not implemented")

    B, N, S, E = x.shape
    assert S <= pe.shape[0], "sequence length exceeds max_len of the PE table"

    rows, cols = B * N, S * E
    # Lane-density guard: cols % 128 == 0 -> unmasked lane-dense stores (the fast
    # path; demo shape 8*32=256 qualifies).  If not, Pallas masks partial lanes —
    # still correct.  (E % 128 == 0 implies cols % 128 == 0, so a (B*N*S, E)
    # re-flatten offers no extra alignment and is not needed.)
    xf = x.reshape(rows, cols)
    if pe_flat is None:
        pe_flat = prepare_pe_flat(pe, S, x.dtype)

    cap_bytes, dual_tc = _tpu_generation_params()
    granule = _sublane_granule(x.dtype)
    row_bytes = cols * np.dtype(x.dtype).itemsize
    tm = _choose_row_tile(rows, row_bytes, granule, cap_bytes, dual_tc)
    grid = (pl.cdiv(rows, tm),)

    out = pl.pallas_call(
        pe_add_kernel,
        out_shape=jax.ShapeDtypeStruct((rows, cols), x.dtype),
        grid=grid,
        in_specs=[
            pl.BlockSpec((tm, cols), lambda i: (i, 0)),   # big lane-dense x slab
            pl.BlockSpec((1, cols), lambda i: (0, 0)),    # constant block -> resident PE
        ],
        out_specs=pl.BlockSpec((tm, cols), lambda i: (i, 0)),
        input_output_aliases={0: 0},                      # write back into x's buffer
        compiler_params=pltpu.CompilerParams(
            dimension_semantics=("parallel",)),
    )(xf, pe_flat)

    return out.reshape(B, N, S, E)


# -----------------------------------------------------------------------------
# Kernel 2 (strategic fusion): pos_encoder(cat_pos_to_dim(past))
#   = ReLU(past @ W + b) + pe[:S]   — one HBM pass over the (B,N,S,E) activation.
# -----------------------------------------------------------------------------
def fused_linear_relu_pe_kernel(x_ref, w_ref, b_ref, pe_ref, o_ref):
    # x_ref: (TM, S, 2) raw 2-D positions; w_ref: (2, E); b_ref: (1, E);
    # pe_ref: (1, S, E).  K=2 contraction as two VPU broadcast-multiplies (no MXU);
    # ReLU and "+pe" fused as the epilogue, hidden under the DMA stream.
    x = x_ref[...]
    w = w_ref[...]
    lin = (x[:, :, 0:1] * w[0:1, :][None, :, :]
           + x[:, :, 1:2] * w[1:2, :][None, :, :]
           + b_ref[...][None, :, :])
    o_ref[...] = (jnp.maximum(lin, 0.0) + pe_ref[...]).astype(o_ref.dtype)


def fused_pos_embed_forward(past: jnp.ndarray, w: jnp.ndarray, b: jnp.ndarray,
                            pe: jnp.ndarray, training: bool = False) -> jnp.ndarray:
    """past: (B, N, S, 2); w: (2, E); b: (E,); pe: (max_len, E).
    Returns ReLU(past @ w + b) + pe[None, None, :S, :] (eval-mode dropout)."""
    if training:
        raise NotImplementedError("training-mode dropout not implemented")

    B, N, S, K = past.shape
    assert K == 2
    E = w.shape[1]
    assert S <= pe.shape[0]

    rows = B * N
    xf = past.reshape(rows, S, K)
    w2 = w.astype(past.dtype)
    b2 = b.reshape(1, E).astype(past.dtype)
    pe_blk = pe[:S, :].astype(past.dtype).reshape(1, S, E)

    cap_bytes, dual_tc = _tpu_generation_params()
    granule = _sublane_granule(past.dtype)
    out_row_bytes = S * E * np.dtype(past.dtype).itemsize   # output dominates HBM traffic
    tm = _choose_row_tile(rows, out_row_bytes, granule, cap_bytes, dual_tc)
    grid = (pl.cdiv(rows, tm),)

    out = pl.pallas_call(
        fused_linear_relu_pe_kernel,
        out_shape=jax.ShapeDtypeStruct((rows, S, E), past.dtype),
        grid=grid,
        in_specs=[
            pl.BlockSpec((tm, S, K), lambda i: (i, 0, 0)),   # raw positions (tiny)
            pl.BlockSpec((K, E), lambda i: (0, 0)),          # resident weight
            pl.BlockSpec((1, E), lambda i: (0, 0)),          # resident bias
            pl.BlockSpec((1, S, E), lambda i: (0, 0, 0)),    # resident PE block
        ],
        out_specs=pl.BlockSpec((tm, S, E), lambda i: (i, 0, 0)),
        compiler_params=pltpu.CompilerParams(
            dimension_semantics=("parallel",)),
    )(xf, w2, b2, pe_blk)

    return out.reshape(B, N, S, E)


# -----------------------------------------------------------------------------
# Demo / correctness check
# -----------------------------------------------------------------------------
if __name__ == "__main__":
    # Small shapes consistent with the module: (batch=2, agents=4, seq=8, e_dim=32)
    # -> flattened add blocks are (8, 256): lane-dense last dim (256 = 2*128).
    B, N, S, E = 2, 4, 8, 32
    max_len = 512

    key = jax.random.PRNGKey(0)
    kx, kp, kw, kb = jax.random.split(key, 4)

    pe = build_pe(E, max_len=max_len, dtype=jnp.float32)

    # ---- standalone PositionalEncoding forward ----
    x = jax.random.normal(kx, (B, N, S, E), dtype=jnp.float32)
    pe_flat = prepare_pe_flat(pe, S, x.dtype)            # hoisted out of the hot path
    out = jax.block_until_ready(positional_encoding_forward(x, pe, pe_flat=pe_flat))
    ref = x + pe[None, None, :S, :]
    np.testing.assert_allclose(np.asarray(out), np.asarray(ref), rtol=1e-6, atol=1e-6)

    # ---- fused producer: ReLU(past @ W + b) + pe  (cat_pos_to_dim + pos_encoder) ----
    past = jax.random.normal(kp, (B, N, S, 2), dtype=jnp.float32)
    w = jax.random.normal(kw, (2, E), dtype=jnp.float32) * 0.5
    b = jax.random.normal(kb, (E,), dtype=jnp.float32) * 0.1
    out2 = jax.block_until_ready(fused_pos_embed_forward(past, w, b, pe))
    ref2 = jnp.maximum(jnp.einsum("bnsk,ke->bnse", past, w) + b, 0.0) + pe[None, None, :S, :]
    np.testing.assert_allclose(np.asarray(out2), np.asarray(ref2), rtol=1e-5, atol=1e-5)

    print("KERNEL_OK")
</pallas_src>

<mosaic_0001>
module attributes {stable_mosaic.version = 11 : i64} {
  func.func @pe_add_kernel(%arg0: i32, %arg1: memref<8x256xf32, #tpu.memory_space<vmem>>, %arg2: memref<1x256xf32, #tpu.memory_space<vmem>>, %arg3: memref<8x256xf32, #tpu.memory_space<vmem>>) attributes {dimension_semantics = [#tpu.dimension_semantics<parallel>], iteration_bounds = array<i64: 1>, scalar_prefetch = 0 : i64, scratch_operands = 0 : i64, tpu.core_type = #tpu.core_type<tc>, window_params = [{transform_indices = @transform_0, window_bounds = array<i64: 8, 256>}, {pipeline_mode = #tpu.pipeline_mode<synchronous>, transform_indices = @transform_1, window_bounds = array<i64: 1, 256>}, {transform_indices = @transform_2, window_bounds = array<i64: 8, 256>}]} {
    %c0 = arith.constant 0 : index
    %c0_0 = arith.constant 0 : index
    %0 = vector.load %arg1[%c0, %c0_0] : memref<8x256xf32, #tpu.memory_space<vmem>>, vector<8x256xf32>
    %c0_1 = arith.constant 0 : index
    %c0_2 = arith.constant 0 : index
    %1 = vector.load %arg2[%c0_1, %c0_2] : memref<1x256xf32, #tpu.memory_space<vmem>>, vector<1x256xf32>
    %2 = vector.broadcast %1 : vector<1x256xf32> to vector<8x256xf32>
    %3 = arith.addf %0, %2 : vector<8x256xf32>
    %c0_3 = arith.constant 0 : index
    %c0_4 = arith.constant 0 : index
    %4 = vector.load %arg3[%c0_3, %c0_4] : memref<8x256xf32, #tpu.memory_space<vmem>>, vector<8x256xf32>
    tpu.vector_store %arg3[%c0_3, %c0_4], %3 {strides = array<i32>} : memref<8x256xf32, #tpu.memory_space<vmem>>, vector<8x256xf32>,
    return
  }
  func.func @transform_0(%arg0: i32) -> (i32, i32) {
    %c0_i32 = arith.constant 0 : i32
    %c0_i32_0 = arith.constant 0 : i32
    return %arg0, %c0_i32 : i32, i32
  }
  func.func @transform_1(%arg0: i32) -> (i32, i32) {
    %c0_i32 = arith.constant 0 : i32
    %c0_i32_0 = arith.constant 0 : i32
    %c0_i32_1 = arith.constant 0 : i32
    return %c0_i32, %c0_i32_0 : i32, i32
  }
  func.func @transform_2(%arg0: i32) -> (i32, i32) {
    %c0_i32 = arith.constant 0 : i32
    %c0_i32_0 = arith.constant 0 : i32
    return %arg0, %c0_i32 : i32, i32
  }
}

</mosaic_0001>

<bundles_post_ra>
// kernel: tpu_custom_call.1
= control target key start
LH: loop header
LB: loop body
LE: loop exit
PB: predicated region body
PF: predicated region fallthrough
CT: control target
= control target key end

     0   :  { %7 = vsyncpa [#allocation3], 0  ;;  %s129_s0 = inlined_call_operand.hbm [shape: f32[8,256], index: 0, kind: input, shape index: {}, may-alias: {0,2}]   ;;  %s130_s1 = inlined_call_operand.vmem [shape: f32[1,256], index: 1, kind: input, shape index: {}]   ;;  %s131_s2 = inlined_call_operand.hbm [shape: f32[8,256], index: 2, kind: output, shape index: {}, may-alias: {0,2}]  }
   0x1   :  { %8 = vsyncpa [#allocation4], 0  ;;  %s103_s9 = smov [#allocation2]  }
   0x2   :  { %s15_s10 = sshll.u32 %s103_s9, 4  ;;  %s16_s10 = int_to_ptr.vmem [resolvable:$true] %s15_s10 }
   0x3   :  { %s67_s11 = scalar_lea.vmem %s16_s10, 256  ;;  %p72_p1 = scmp.lt.s32.totalorder %s16_s10, %s16_s10 }
   0x4   :  { %p68_p0 = scmp.ne.s32.totalorder %s16_s10, %s67_s11  ;;  %p73_p2 = scmp.lt.s32.totalorder %s67_s11, %s67_s11 }
   0x6   :  { %p74_p3 = por %p73_p2, %p72_p1 }
   0x8   :  { %p75_p4 = pnand %p74_p3, %p68_p0 }
   0xa   :  { %78 = shalt.err (!%p75_p4)
}
   0xb   :  { %18 = dma.hbm_to_vmem [thread:$0]  %s129_s0, 256, %s16_s10, [#allocation3]  }
   0xc   :  { %99 = dma.done.wait [#allocation3], 256  }
   0xd   :  { %100 = vsyncadd [#allocation3], 4294967040  ;;  %v28_v0 = vlaneseq  ;;  %v24_v4 = vld [vmem:[#allocation2] sm:$0xff]  ;;  %v25_v6 = vld [vmem:[#allocation2 + $0x8] sm:$0xff]  ;;  %s104_s16 = smov [#allocation5]  }
   0xe   :  { %v26_v5 = vld [vmem:[%s130_s1] sm:$0x3]  ;;  %s48_s17 = sshll.u32 %s104_s16, 4  ;;  %s49_s17 = int_to_ptr.vmem [resolvable:$true] %s48_s17 }
   0xf   :  { %v29_v1 = vshrl.u32 %v28_v0, 7  ;;  %s79_s0 = scalar_lea.vmem %s49_s17, 256  ;;  %p84_p6 = scmp.lt.s32.totalorder %s49_s17, %s49_s17 }
  0x10   :  { %p80_p5 = scmp.ne.s32.totalorder %s49_s17, %s79_s0  ;;  %p85_p7 = scmp.lt.s32.totalorder %s79_s0, %s79_s0 }
  0x11   :  { %v30_v2 = vsub.s32 0, %v29_v1  ;;  %v34_v3 = vsub.s32 1, %v29_v1 }
  0x12   :  { %p86_p8 = por %p85_p7, %p84_p6 }
  0x13   :  { %v31_v7 = vrot.slane %v26_v5, %v30_v2  ;;  %v35_v8 = vrot.slane %v26_v5, %v34_v3 }
  0x14   :  { %p87_p9 = pnand %p86_p8, %p80_p5 }
  0x15   :  { %v38_v9 = vadd.f32 %v31_v7, %v24_v4  ;;  %v39_v10 = vadd.f32 %v35_v8, %v25_v6 }
  0x17   :  { %40 = vst [vmem:[#allocation5] sm:$0xff] %v38_v9  ;;  %41 = vst [vmem:[#allocation5 + $0x8] sm:$0xff] %v39_v10 }
  0x18   :  { %90 = shalt.err (!%p87_p9)
}
  0x19   :  { %51 = dma.vmem_to_hbm [thread:$0]  %s49_s17, 256, %s131_s2, [#allocation4]  }
  0x1a   :  { %101 = dma.done.wait [#allocation4], 256  }
  0x1b   :  { %102 = vsyncadd [#allocation4], 4294967040 }
  0x1c   :  { %55 = vsyncpa [#allocation3], 1 }
  0x1d   :  { %56 = vsyncpa [#allocation4], 1 }

</bundles_post_ra>
